<compile_context>
chip_gen: v7x
topology: tpu7x:2x2x1
jax: 0.10.0
libtpu: 0.0.40
codegen_flags: <defaults>
</compile_context>

<pallas_src>
import jax
import jax.numpy as jnp
from jax.experimental import pallas as pl
from jax.experimental.pallas import tpu as pltpu


NUM_CORES = 2                       # leading "parallel" grid axis (v7x 2-TC split)
SUB = 8                             # sublane granularity for the row-block
TARGET_STEP_BYTES = 8 * 1024 * 1024 # combined pred+adj bytes streamed per grid step


def custom_loss(predicted_values, adjacency_matrices):
    """predicted_values, adjacency_matrices: [R, N, N] -> scalar loss (float32)."""
    R, N, _ = predicted_values.shape
    M = R * N

    # Layout-free reshapes only -- no astype, no pad, no extra HBM passes.
    pred2 = predicted_values.reshape(M, N)
    adj2 = adjacency_matrices.reshape(M, N)

    # Pick a row-block (multiple of 8) targeting ~TARGET_STEP_BYTES per step.
    bytes_per_row = N * (pred2.dtype.itemsize + adj2.dtype.itemsize)
    if M >= SUB:
        rb = max(SUB, (TARGET_STEP_BYTES // max(bytes_per_row, 1)) // SUB * SUB)
        row_block = int(min(rb, (M // SUB) * SUB))
    else:
        row_block = M  # block == full dim (legal even when < 8)

    total_blocks = pl.cdiv(M, row_block)
    steps = pl.cdiv(total_blocks, NUM_CORES)
    # Mask whenever the last row-block is partial or the block count doesn't split
    # evenly across the core axis (extra (c,s) steps re-read a clamped block and
    # contribute exactly zero).
    needs_mask = (M % row_block != 0) or (total_blocks % NUM_CORES != 0)

    def in_map(c, s):
        blk = c * steps + s
        return (jnp.minimum(blk, total_blocks - 1), 0)   # clamp: never DMA OOB

    def kernel(pred_ref, adj_ref, out_ref):
        # pred_ref/adj_ref: (row_block, N) native dtype; out_ref: (1, 1, N) f32
        s = pl.program_id(1)

        @pl.when(s == 0)
        def _():
            out_ref[...] = jnp.zeros_like(out_ref)

        p = pred_ref[...].astype(jnp.float32)   # in-kernel cast (free vs. HBM pass)
        a = adj_ref[...].astype(jnp.float32)

        # stable BCE-with-logits:
        #   a*log(sigmoid(p)) + (1-a)*log(1-sigmoid(p)) == a*p - softplus(p)
        softplus = jnp.maximum(p, 0.0) + jnp.log1p(jnp.exp(-jnp.abs(p)))
        term = a * p - softplus                 # (row_block, N)

        if needs_mask:
            c = pl.program_id(0)
            row0 = (c * steps + s) * row_block  # unclamped global row offset
            rows = jax.lax.broadcasted_iota(jnp.int32, term.shape, 0)
            term = jnp.where(row0 + rows < M, term, 0.0)

        # NOTE: Mosaic fuses the elementwise term with this row reduce per-vreg;
        # if a bundle dump ever shows a materialized (row_block, N) temp, fall back
        # to a lax.fori_loop over row sub-chunks accumulating into out_ref.
        out_ref[...] += jnp.sum(term, axis=0, keepdims=True)[None]

    total = M * N
    cost = pl.CostEstimate(
        flops=6 * total,
        transcendentals=2 * total,
        bytes_accessed=int(
            pred2.size * pred2.dtype.itemsize
            + adj2.size * adj2.dtype.itemsize
            + NUM_CORES * N * 4
        ),
    )

    partials = pl.pallas_call(
        kernel,
        out_shape=jax.ShapeDtypeStruct((NUM_CORES, 1, N), jnp.float32),
        grid_spec=pltpu.PrefetchScalarGridSpec(
            num_scalar_prefetch=0,
            grid=(NUM_CORES, steps),
            in_specs=[
                pl.BlockSpec((row_block, N), in_map),
                pl.BlockSpec((row_block, N), in_map),
            ],
            # same output block across the reduction axis -> resident accumulator
            out_specs=pl.BlockSpec((1, 1, N), lambda c, s: (c, 0, 0)),
        ),
        compiler_params=pltpu.CompilerParams(
            dimension_semantics=("parallel", "arbitrary"),
            vmem_limit_bytes=32 * 1024 * 1024,
        ),
        cost_estimate=cost,
    )(pred2, adj2)

    # single cross-lane reduce + negation, once, outside the kernel loop
    return -jnp.sum(partials)


def _reference_loss(predicted_values, adjacency_matrices):
    p = predicted_values.astype(jnp.float32)
    a = adjacency_matrices.astype(jnp.float32)
    # stable form; equal to a*log(sig(p)) + (1-a)*log(1-sig(p)) wherever finite
    term = a * p - (jnp.maximum(p, 0.0) + jnp.log1p(jnp.exp(-jnp.abs(p))))
    return -jnp.sum(term)


if __name__ == "__main__":
    key = jax.random.PRNGKey(0)

    # Primary small case: 4 relations, 16 entities.
    R, N = 4, 16
    k_pred, k_adj, k2_pred, k2_adj = jax.random.split(key, 4)
    predicted_values = jax.random.normal(k_pred, (R, N, N), dtype=jnp.float32)
    adjacency_matrices = (
        jax.random.uniform(k_adj, (R, N, N)) > 0.5
    ).astype(jnp.float32)

    loss = custom_loss(predicted_values, adjacency_matrices)
    loss = jax.block_until_ready(loss)
    ref = _reference_loss(predicted_values, adjacency_matrices)
    assert jnp.allclose(loss, ref, rtol=1e-5, atol=1e-4), (loss, ref)

    # Ragged case exercising the in-kernel mask (partial row-block, odd lane count).
    R2, N2 = 5, 6
    pred2_in = jax.random.normal(k2_pred, (R2, N2, N2), dtype=jnp.float32)
    adj2_in = (jax.random.uniform(k2_adj, (R2, N2, N2)) > 0.5).astype(jnp.float32)
    loss2 = jax.block_until_ready(custom_loss(pred2_in, adj2_in))
    ref2 = _reference_loss(pred2_in, adj2_in)
    assert jnp.allclose(loss2, ref2, rtol=1e-5, atol=1e-4), (loss2, ref2)

    print("KERNEL_OK")
</pallas_src>

<mosaic_0001>
module attributes {stable_mosaic.version = 11 : i64} {
  func.func @kernel(%arg0: i32, %arg1: i32, %arg2: memref<64x16xf32, #tpu.memory_space<vmem>>, %arg3: memref<64x16xf32, #tpu.memory_space<vmem>>, %arg4: memref<1x1x16xf32, #tpu.memory_space<vmem>>) attributes {dimension_semantics = [#tpu.dimension_semantics<parallel>, #tpu.dimension_semantics<arbitrary>], iteration_bounds = array<i64: 2, 1>, scalar_prefetch = 0 : i64, scratch_operands = 0 : i64, tpu.core_type = #tpu.core_type<tc>, window_params = [{transform_indices = @transform_0, window_bounds = array<i64: 64, 16>}, {transform_indices = @transform_1, window_bounds = array<i64: 64, 16>}, {transform_indices = @transform_2, window_bounds = array<i64: 1, 1, 16>}]} {
    %c0_i32 = arith.constant 0 : i32
    %0 = arith.cmpi eq, %arg1, %c0_i32 : i32
    %1 = arith.extui %0 : i1 to i32
    %c0_i32_0 = arith.constant 0 : i32
    %2 = arith.cmpi ne, %1, %c0_i32_0 : i32
    scf.if %2 {
      %cst_14 = arith.constant 0.000000e+00 : f32
      %31 = vector.broadcast %cst_14 : f32 to vector<1x1x16xf32>
      %c0_15 = arith.constant 0 : index
      %c0_16 = arith.constant 0 : index
      %c0_17 = arith.constant 0 : index
      %32 = vector.load %arg4[%c0_15, %c0_16, %c0_17] : memref<1x1x16xf32, #tpu.memory_space<vmem>>, vector<1x1x16xf32>
      tpu.vector_store %arg4[%c0_15, %c0_16, %c0_17], %31 {strides = array<i32>} : memref<1x1x16xf32, #tpu.memory_space<vmem>>, vector<1x1x16xf32>,
    } else {
    }
    %c0 = arith.constant 0 : index
    %c0_1 = arith.constant 0 : index
    %3 = vector.load %arg2[%c0, %c0_1] : memref<64x16xf32, #tpu.memory_space<vmem>>, vector<64x16xf32>
    %c0_2 = arith.constant 0 : index
    %c0_3 = arith.constant 0 : index
    %4 = vector.load %arg3[%c0_2, %c0_3] : memref<64x16xf32, #tpu.memory_space<vmem>>, vector<64x16xf32>
    %cst = arith.constant 0.000000e+00 : f32
    %5 = vector.broadcast %cst : f32 to vector<64x16xf32>
    %6 = arith.maximumf %3, %5 : vector<64x16xf32>
    %7 = math.absf %3 : vector<64x16xf32>
    %cst_4 = arith.constant 0.000000e+00 : f32
    %8 = vector.broadcast %cst_4 : f32 to vector<64x16xf32>
    %9 = arith.subf %8, %7 : vector<64x16xf32>
    %10 = math.exp %9 : vector<64x16xf32>
    %11 = math.log1p %10 : vector<64x16xf32>
    %12 = arith.addf %6, %11 : vector<64x16xf32>
    %13 = arith.mulf %4, %3 : vector<64x16xf32>
    %14 = arith.subf %13, %12 : vector<64x16xf32>
    %c1_i32 = arith.constant 1 : i32
    %15 = arith.muli %arg0, %c1_i32 : i32
    %16 = arith.addi %15, %arg1 : i32
    %c64_i32 = arith.constant 64 : i32
    %17 = arith.muli %16, %c64_i32 : i32
    %18 = tpu.iota {dimensions = array<i32: 0>} : vector<64x16xi32>
    %19 = vector.broadcast %17 : i32 to vector<64x16xi32>
    %20 = arith.addi %19, %18 : vector<64x16xi32>
    %c64_i32_5 = arith.constant 64 : i32
    %21 = vector.broadcast %c64_i32_5 : i32 to vector<64x16xi32>
    %22 = arith.cmpi slt, %20, %21 : vector<64x16xi32>
    %cst_6 = arith.constant 0.000000e+00 : f32
    %23 = vector.broadcast %cst_6 : f32 to vector<64x16xf32>
    %24 = arith.select %22, %14, %23 : vector<64x16xi1>, vector<64x16xf32>
    %c0_7 = arith.constant 0 : index
    %c0_8 = arith.constant 0 : index
    %c0_9 = arith.constant 0 : index
    %25 = vector.load %arg4[%c0_7, %c0_8, %c0_9] : memref<1x1x16xf32, #tpu.memory_space<vmem>>, vector<1x1x16xf32>
    %cst_10 = arith.constant dense<0.000000e+00> : vector<16xf32>
    %26 = vector.multi_reduction <add>, %24, %cst_10 [0] : vector<64x16xf32> to vector<16xf32>
    %27 = vector.shape_cast %26 : vector<16xf32> to vector<1x16xf32>
    %28 = vector.shape_cast %27 : vector<1x16xf32> to vector<1x1x16xf32>
    %29 = arith.addf %25, %28 : vector<1x1x16xf32>
    %c0_11 = arith.constant 0 : index
    %c0_12 = arith.constant 0 : index
    %c0_13 = arith.constant 0 : index
    %30 = vector.load %arg4[%c0_11, %c0_12, %c0_13] : memref<1x1x16xf32, #tpu.memory_space<vmem>>, vector<1x1x16xf32>
    tpu.vector_store %arg4[%c0_11, %c0_12, %c0_13], %29 {strides = array<i32>} : memref<1x1x16xf32, #tpu.memory_space<vmem>>, vector<1x1x16xf32>,
    return
  }
  func.func @transform_0(%arg0: i32, %arg1: i32) -> (i32, i32) {
    %c1_i32 = arith.constant 1 : i32
    %0 = arith.muli %arg0, %c1_i32 : i32
    %1 = arith.addi %0, %arg1 : i32
    %c0_i32 = arith.constant 0 : i32
    %2 = arith.minsi %1, %c0_i32 : i32
    %c0_i32_0 = arith.constant 0 : i32
    %c0_i32_1 = arith.constant 0 : i32
    return %2, %c0_i32_0 : i32, i32
  }
  func.func @transform_1(%arg0: i32, %arg1: i32) -> (i32, i32) {
    %c1_i32 = arith.constant 1 : i32
    %0 = arith.muli %arg0, %c1_i32 : i32
    %1 = arith.addi %0, %arg1 : i32
    %c0_i32 = arith.constant 0 : i32
    %2 = arith.minsi %1, %c0_i32 : i32
    %c0_i32_0 = arith.constant 0 : i32
    %c0_i32_1 = arith.constant 0 : i32
    return %2, %c0_i32_0 : i32, i32
  }
  func.func @transform_2(%arg0: i32, %arg1: i32) -> (i32, i32, i32) {
    %c0_i32 = arith.constant 0 : i32
    %c0_i32_0 = arith.constant 0 : i32
    %c0_i32_1 = arith.constant 0 : i32
    return %arg0, %c0_i32, %c0_i32_0 : i32, i32, i32
  }
}

</mosaic_0001>

<bundles_post_ra>
// kernel: tpu_custom_call.1
= control target key start
LH: loop header
LB: loop body
LE: loop exit
PB: predicated region body
PF: predicated region fallthrough
CT: control target
= control target key end

     0   :  { %7 = vsyncpa [#allocation3], 0  ;;  %s1065_s0 = inlined_call_operand.vmem [shape: f32[64,16], index: 0, kind: input, shape index: {}]   ;;  %s1066_s1 = inlined_call_operand.vmem [shape: f32[64,16], index: 1, kind: input, shape index: {}]   ;;  %s1067_s2 = inlined_call_operand.hbm [shape: f32[2,1,16], index: 2, kind: output, shape index: {}]  }
   0x1   :  { %9 = vsyncpa [#allocation3 + $0x1], 0  ;;  %s725_s9 = smov 0   ;;  %s727_s10 = smov 0  }
   0x2   :  { %s729_s11 = smov 0   ;;  %s731_s12 = smov 0  }
   0x3   :  { %s733_s13 = smov 0   ;;  %s735_s14 = smov 0  }
   0x4 LB: > { %s527_s15 = sadd.s32 4294967295, %s706_s14   ;;  %s528_s16 = sadd.s32 4294967294, %s706_s14   ;;  %s706_s14 = sphi %s735_s14, %s15_s14   ;;  %s702_s13 = sphi %s733_s13, %s1088_s13   ;;  %s698_s12 = sphi %s731_s12, %s1087_s12   ;;  %s694_s11 = sphi %s729_s11, %s1086_s11   ;;  %s690_s10 = sphi %s727_s10, %s1085_s10   ;;  %s686_s9 = sphi %s725_s9, %s1084_s9  }
   0x5   : > { %s27_s17 = sadd.s32 1, %s702_s13  ;;  %s98_s18 = sadd.s32 1, %s694_s11 }
   0x6   : > { %p29_p0 = scmp.ge.s32.totalorder %s27_s17, 2  ;;  %p108_p1 = scmp.ne.s32.totalorder %s694_s11, %s690_s10 }
   0x7   : > { %p109_p2 = scmp.eq.s32.totalorder %s527_s15, 1  ;;  %p114_p3 = scmp.ne.s32.totalorder %s690_s10, %s686_s9 }
   0x8   : > { %s1090_s17 = smov (%p29_p0, %s27_s17), 0  ;;  %p115_p5 = scmp.eq.s32.totalorder %s528_s16, 1 }
   0x9   : > { %p765_p4 = por %p109_p2, %p108_p1  ;;  %s95_s20 = ssub.s32 %s702_s13, %s1090_s17 }
   0xa   : > { %p531_p6 = scmp.ge.s32.totalorder %s706_s14, 1  ;;  %p96_p7 = scmp.eq.s32.totalorder %s95_s20, 0 }
   0xb   : > { %p772_p8 = por %p115_p5, %p114_p3  ;;  %p163_p9 = scmp.lt.s32.totalorder %s706_s14, 3 }
   0xc   : > { %s778_s22 = scalar_select %p96_p7, %s694_s11, %s98_s18  }
   0xd   : > { %p164_p10 = pnand %p531_p6, %p163_p9 }
   0xe   : > { %s193_s23 = sand.u32 (!%p164_p10), 1, %s690_s10   ;;  %p196_p11 = scmp.lt.s32.totalorder (!%p164_p10), %s698_s12, 0  ;;  %vm223_vm0 = vcmask (!%p164_p10), 122880   ;;  %v708_v0 = vmov (!%p164_p10), 0.0   ;;  %v379_v18 = vlaneseq (!%p164_p10)  ;;  %vm414_vm5 = vcmask (!%p164_p10), 130048  }
   0xf   : > { %167 = sbr.rel (%p164_p10) target bundleno = 115 (0x73), region = 28  ;;  %s785_s25 = scalar_lea.vmem (!%p164_p10), [#allocation2], %s193_s23 }
  0x10   : > { %224 = vst.msk [vmem:[%s785_s25] sm:$0x1] (!%p164_p10), %vm223_vm0, %v708_v0  ;;  %s536_s3 = sshll.u32 (!%p164_p10), %s698_s12, 6  ;;  %v380_v30 = vshrl.u32 (!%p164_p10), %v379_v18, 7  ;;  %s537_s7 = sshll.u32 (!%p164_p10), %s698_s12, 4 }
  0x11   : > { %v388_v34 = vstv (!%p164_p10), %s536_s3  ;;  %s452_s8 = sshll.u32 (!%p164_p10), %s785_s25, 4  ;;  %s1014_s18 = scalar_lea.hbm (!%p164_p10), %s1067_s2, %s537_s7  ;;  %s1016_s8 = int_to_ptr.vmem [resolvable:$true] %s452_s8 }
  0x12   : > { %v381_v35 = vadd.s32 (!%p164_p10), 8, %v380_v30  ;;  %v382_v36 = vadd.s32 (!%p164_p10), 16, %v380_v30  ;;  %v383_v37 = vadd.s32 (!%p164_p10), 24, %v380_v30  ;;  %v384_v39 = vadd.s32 (!%p164_p10), 32, %v380_v30  ;;  %s440_s20 = scalar_lea.sflag (!%p164_p10), [#allocation3], %s193_s23 }
  0x13   : > { %v385_v40 = vadd.s32 (!%p164_p10), 40, %v380_v30  ;;  %v386_v41 = vadd.s32 (!%p164_p10), 48, %v380_v30  ;;  %v387_v42 = vadd.s32 (!%p164_p10), 56, %v380_v30  ;;  %v829_v43 = vadd.s32 (!%p164_p10), %v388_v34, %v380_v30 }
  0x14   : > { %v831_v44 = vadd.s32 (!%p164_p10), %v388_v34, %v381_v35  ;;  %v833_v45 = vadd.s32 (!%p164_p10), %v388_v34, %v382_v36  ;;  %v835_v46 = vadd.s32 (!%p164_p10), %v388_v34, %v383_v37  ;;  %v837_v47 = vadd.s32 (!%p164_p10), %v388_v34, %v384_v39 }
  0x15   : > { %v839_v48 = vadd.s32 (!%p164_p10), %v388_v34, %v385_v40  ;;  %v841_v49 = vadd.s32 (!%p164_p10), %v388_v34, %v386_v41  ;;  %v847_v55 = vadd.s32 (!%p164_p10), %v388_v34, %v387_v42  ;;  %vm397_vm3 = vcmp.lt.s32.totalorder (!%p164_p10), %v829_v43, 64 }
  0x16   : > { %s197_s24 = scalar_select %p196_p11, %s698_s12, 0  ;;  %vm398_vm4 = vcmp.lt.s32.totalorder %v831_v44, 64  ;;  %vm399_vm6 = vcmp.lt.s32.totalorder %v833_v45, 64  ;;  %vm400_vm10 = vcmp.lt.s32.totalorder %v835_v46, 64  ;;  %vm401_vm11 = vcmp.lt.s32.totalorder %v837_v47, 64 }
  0x17   : > { %vm402_vm13 = vcmp.lt.s32.totalorder %v839_v48, 64  ;;  %vm403_vm15 = vcmp.lt.s32.totalorder %v841_v49, 64  ;;  %s709_s12 = smov [#allocation2]  }
  0x18   : > { %s532_s26 = sshll.u32 %s197_s24, 3  ;;  %s628_s24 = scalar_lea.vmem %s1016_s8, 16 }
  0x19   : > { %p199_p12 = scmp.lt.s32.totalorder %s532_s26, 7  ;;  %p629_p13 = scmp.ne.s32.totalorder %s1016_s8, %s628_s24 }
  0x1b   : > { %s1092_s26 = smov (!%p199_p12, %s532_s26), 7  ;;  %p630_p0 = pnand %p629_p13, %p765_p4 }
  0x1c   : > { %s533_s27 = sshll.u32 %s1092_s26, 3  ;;  %s632_s26 = sshll.u32 %s709_s12, 4  ;;  %s633_s26 = int_to_ptr.vmem [resolvable:$false] %s632_s26 }
  0x1d   : > { %s202_s30 = scalar_lea.vmem %s1065_s0, %s533_s27  ;;  %s827_s6 = scalar_lea.vmem %s1066_s1, %s533_s27 }
  0x1e   : > { %v797_v1 = vld [vmem:[%s202_s30] sm:$0xff]  ;;  %v799_v2 = vld [vmem:[%s202_s30 + $0x8] sm:$0xff]  ;;  %v801_v3 = vld [vmem:[%s202_s30 + $0x10] sm:$0xff]  ;;  %p631_p1 = pneg %p630_p0  ;;  %s634_s27 = scalar_lea.vmem %s633_s26, 32 }
  0x1f   : > { %v803_v4 = vld [vmem:[%s202_s30 + $0x18] sm:$0xff]  ;;  %v805_v5 = vld [vmem:[%s202_s30 + $0x20] sm:$0xff]  ;;  %v807_v6 = vld [vmem:[%s202_s30 + $0x28] sm:$0xff]  ;;  %v249_v8 = vand.u32 2147483647, %v797_v1  ;;  %v241_v52 = vmax.f32 %v797_v1, 0.0  ;;  %p635_p2 = scmp.lt.s32.totalorder %s1016_s8, %s633_s26  ;;  %p636_p3 = scmp.lt.s32.totalorder %s634_s27, %s628_s24 }
  0x20   : > { %v809_v7 = vld [vmem:[%s202_s30 + $0x30] sm:$0xff]  ;;  %v812_v9 = vld [vmem:[%s202_s30 + $0x38] sm:$0xff]  ;;  %v250_v10 = vand.u32 2147483647, %v799_v2  ;;  %v251_v11 = vand.u32 2147483647, %v801_v3 }
  0x21   : > { %v252_v12 = vand.u32 2147483647, %v803_v4  ;;  %v253_v13 = vand.u32 2147483647, %v805_v5  ;;  %v254_v14 = vand.u32 2147483647, %v807_v6  ;;  %p637_p5 = por %p636_p3, %p635_p2 }
  0x22   : > { %v255_v15 = vand.u32 2147483647, %v809_v7  ;;  %v257_v16 = vsub.f32 0.0, %v249_v8  ;;  %v258_v17 = vsub.f32 0.0, %v250_v10  ;;  %v256_v19 = vand.u32 2147483647, %v812_v9 }
  0x23   : > { %v259_v20 = vsub.f32 0.0, %v251_v11  ;;  %v260_v21 = vsub.f32 0.0, %v252_v12  ;;  %v261_v22 = vsub.f32 0.0, %v253_v13  ;;  %v262_v23 = vsub.f32 0.0, %v254_v14  ;;  %v233_v51 = vld [vmem:[%s827_s6] sm:$0xff]  ;;  %v234_v57 = vld [vmem:[%s827_s6 + $0x8] sm:$0xff]  ;;  %p638_p6 = pnand %p637_p5, %p631_p1 }
  0x24   : > { %v265_v24 = vmul.f32 1.442695, %v257_v16  ;;  %v267_v25 = vmul.f32 1.442695, %v258_v17  ;;  %v263_v26 = vsub.f32 0.0, %v255_v15  ;;  %v264_v31 = vsub.f32 0.0, %v256_v19 }
  0x25   : > { %v269_v27 = vmul.f32 1.442695, %v259_v20  ;;  %v271_v28 = vmul.f32 1.442695, %v260_v21  ;;  %v273_v29 = vmul.f32 1.442695, %v261_v22  ;;  %v862_v18 = vmul.f32 %v233_v51, %v797_v1 }
  0x26   : > { %596 = vpow2.f32 %v265_v24  ;;  %v275_v32 = vmul.f32 1.442695, %v262_v23  ;;  %v277_v33 = vmul.f32 1.442695, %v263_v26  ;;  %v279_v38 = vmul.f32 1.442695, %v264_v31 }
  0x27   : > { %598 = vpow2.f32 %v267_v25  ;;  %v242_v53 = vmax.f32 %v799_v2, 0.0  ;;  %v243_v54 = vmax.f32 %v801_v3, 0.0  ;;  %v244_v58 = vmax.f32 %v803_v4, 0.0  ;;  %v235_v63 = vld [vmem:[%s827_s6 + $0x10] sm:$0xff]  ;;  %v236_v13 = vld [vmem:[%s827_s6 + $0x18] sm:$0xff]  ;;  %v237_v14 = vld [vmem:[%s827_s6 + $0x20] sm:$0xff] }
  0x28   : > { %600 = vpow2.f32 %v269_v27  ;;  %v245_v59 = vmax.f32 %v805_v5, 0.0  ;;  %v246_v60 = vmax.f32 %v807_v6, 0.0  ;;  %v247_v0 = vmax.f32 %v809_v7, 0.0  ;;  %v238_v15 = vld [vmem:[%s827_s6 + $0x28] sm:$0xff]  ;;  %v239_v23 = vld [vmem:[%s827_s6 + $0x30] sm:$0xff] }
  0x29   : > { %602 = vpow2.f32 %v271_v28  ;;  %v248_v8 = vmax.f32 %v812_v9, 0.0  ;;  %v867_v22 = vmul.f32 %v234_v57, %v799_v2  ;;  %v872_v26 = vmul.f32 %v235_v63, %v801_v3 }
  0x2a   : > { %604 = vpow2.f32 %v273_v29  ;;  %v877_v29 = vmul.f32 %v236_v13, %v803_v4  ;;  %v880_v30 = vmul.f32 %v237_v14, %v805_v5  ;;  %v883_v31 = vmul.f32 %v238_v15, %v807_v6 }
  0x2b   : > { %606 = vpow2.f32 %v275_v32  ;;  %v899_v39 = vmul.f32 %v239_v23, %v809_v7 }
  0x2c   : > { %608 = vpow2.f32 %v277_v33 }
  0x2d   : > { %610 = vpow2.f32 %v279_v38 }
  0x30   : > { %v597_v50 = vpop.eup %596 }
  0x31   : > { %v599_v56 = vpop.eup %598  ;;  %v281_v61 = vadd.f32 1.0, %v597_v50  ;;  %v284_v10 = vmul.f32 -0.5, %v597_v50  ;;  %v287_v20 = vand.u32 2147483647, %v597_v50 }
  0x32   : > { %v601_v62 = vpop.eup %600  ;;  %v290_v11 = vadd.f32 1.0, %v599_v56  ;;  %v293_v16 = vmul.f32 -0.5, %v599_v56  ;;  %v296_v21 = vand.u32 2147483647, %v599_v56 }
  0x33   : > { %v856_v12 = vpop.eup %602  ;;  %612 = vlog2.f32 %v281_v61  ;;  %v299_v17 = vadd.f32 1.0, %v601_v62  ;;  %v302_v24 = vmul.f32 -0.5, %v601_v62  ;;  %v285_v28 = vadd.f32 1.0, %v284_v10 }
  0x34   : > { %v864_v19 = vpop.eup %604  ;;  %614 = vlog2.f32 %v290_v11  ;;  %v308_v25 = vadd.f32 1.0, %v856_v12  ;;  %v294_v33 = vadd.f32 1.0, %v293_v16  ;;  %v311_v34 = vmul.f32 -0.5, %v856_v12 }
  0x35   : > { %616 = vlog2.f32 %v299_v17  ;;  %v874_v27 = vpop.eup %606  ;;  %v317_v35 = vadd.f32 1.0, %v864_v19  ;;  %vm889_vm1 = vcmp.lt.f32.partialorder %v287_v20, 0.0004427343  ;;  %vm893_vm2 = vcmp.lt.f32.partialorder %v296_v21, 0.0004427343 }
  0x36   : > { %v885_v32 = vpop.eup %608  ;;  %618 = vlog2.f32 %v308_v25  ;;  %v320_v38 = vmul.f32 -0.5, %v864_v19  ;;  %v303_v41 = vadd.f32 1.0, %v302_v24  ;;  %v305_v42 = vand.u32 2147483647, %v601_v62 }
  0x37   : > { %v901_v40 = vpop.eup %610  ;;  %620 = vlog2.f32 %v317_v35  ;;  %v326_v51 = vadd.f32 1.0, %v874_v27  ;;  %v286_v57 = vmul.f32 %v597_v50, %v285_v28  ;;  %v314_v61 = vand.u32 2147483647, %v856_v12 }
  0x38   : > { %v329_v63 = vmul.f32 -0.5, %v874_v27  ;;  %v335_v10 = vadd.f32 1.0, %v885_v32  ;;  %v295_v11 = vmul.f32 %v599_v56, %v294_v33  ;;  %v312_v13 = vadd.f32 1.0, %v311_v34 }
  0x39   : > { %v323_v14 = vand.u32 2147483647, %v864_v19  ;;  %622 = vlog2.f32 %v326_v51  ;;  %v321_v15 = vadd.f32 1.0, %v320_v38  ;;  %v338_v50 = vmul.f32 -0.5, %v885_v32 }
  0x3a   : > { %624 = vlog2.f32 %v335_v10  ;;  %v344_v16 = vadd.f32 1.0, %v901_v40  ;;  %v304_v20 = vmul.f32 %v601_v62, %v303_v41  ;;  %vm913_vm7 = vcmp.lt.f32.partialorder %v305_v42, 0.0004427343 }
  0x3b   : > { %v332_v56 = vand.u32 2147483647, %v874_v27  ;;  %v347_v23 = vmul.f32 -0.5, %v901_v40  ;;  %vm919_vm8 = vcmp.lt.f32.partialorder %v314_v61, 0.0004427343  ;;  %v330_v33 = vadd.f32 1.0, %v329_v63 }
  0x3c   : > { %626 = vlog2.f32 %v344_v16  ;;  %v313_v62 = vmul.f32 %v856_v12, %v312_v13  ;;  %vm924_vm9 = vcmp.lt.f32.partialorder %v323_v14, 0.0004427343  ;;  %v341_v41 = vand.u32 2147483647, %v885_v32 }
  0x3d   : > { %v613_v17 = vpop.eup %612  ;;  %v322_v61 = vmul.f32 %v864_v19, %v321_v15  ;;  %v339_v63 = vadd.f32 1.0, %v338_v50  ;;  %vm936_vm12 = vcmp.lt.f32.partialorder %v332_v56, 0.0004427343  ;;  %v348_v14 = vadd.f32 1.0, %v347_v23 }
  0x3e   : > { %v615_v24 = vpop.eup %614  ;;  %v283_v25 = vmul.f32 0.6931472, %v613_v17  ;;  %v331_v19 = vmul.f32 %v874_v27, %v330_v33  ;;  %vm948_vm14 = vcmp.lt.f32.partialorder %v341_v41, 0.0004427343  ;;  %v350_v50 = vand.u32 2147483647, %v901_v40 }
  0x3f   : > { %v617_v34 = vpop.eup %616  ;;  %v292_v35 = vmul.f32 0.6931472, %v615_v24  ;;  %v340_v27 = vmul.f32 %v885_v32, %v339_v63  ;;  %v349_v21 = vmul.f32 %v901_v40, %v348_v14 }
  0x40   : > { %v289_v42 = vsel %vm889_vm1, %v286_v57, %v283_v25  ;;  %v301_v51 = vmul.f32 0.6931472, %v617_v34  ;;  %v619_v10 = vpop.eup %618  ;;  %v240_v25 = vld [vmem:[%s827_s6 + $0x38] sm:$0xff]  ;;  %vm351_vm1 = vcmp.lt.f32.partialorder %v350_v50, 0.0004427343 }
  0x41   : > { %v298_v12 = vsel %vm893_vm2, %v295_v11, %v292_v35  ;;  %v353_v16 = vadd.f32 %v289_v42, %v241_v52  ;;  %v310_v57 = vmul.f32 0.6931472, %v619_v10  ;;  %v621_v37 = vpop.eup %620  ;;  %vm404_vm2 = vcmp.lt.s32.totalorder %v847_v55, 64 }
  0x42   : > { %v307_v36 = vsel %vm913_vm7, %v304_v20, %v301_v51  ;;  %v354_v15 = vadd.f32 %v298_v12, %v242_v53  ;;  %v319_v53 = vmul.f32 0.6931472, %v621_v37 }
  0x43   : > { %v355_v1 = vadd.f32 %v307_v36, %v243_v54  ;;  %v369_v52 = vsub.f32 %v862_v18, %v353_v16  ;;  %v316_v2 = vsel %vm919_vm8, %v313_v62, %v310_v57  ;;  %v623_v20 = vpop.eup %622  ;;  %v413_v57 = vld [vmem:[%s785_s25] sm:$0x1] }
  0x44   : > { %v370_v17 = vsub.f32 %v867_v22, %v354_v15  ;;  %v356_v3 = vadd.f32 %v316_v2, %v244_v58  ;;  %v625_v56 = vpop.eup %624  ;;  %v325_v23 = vsel %vm924_vm9, %v322_v61, %v319_v53  ;;  %v328_v24 = vmul.f32 0.6931472, %v623_v20 }
  0x45   : > { %v371_v54 = vsub.f32 %v872_v26, %v355_v1  ;;  %v405_v18 = vsel %vm397_vm3, %v369_v52, 0.0  ;;  %v337_v40 = vmul.f32 0.6931472, %v625_v56  ;;  %v357_v4 = vadd.f32 %v325_v23, %v245_v59 }
  0x46   : > { %v406_v32 = vsel %vm398_vm4, %v370_v17, 0.0  ;;  %v415_v22 = vsel %vm414_vm5, %v405_v18, 0.0  ;;  %v372_v58 = vsub.f32 %v877_v29, %v356_v3  ;;  %v627_v26 = vpop.eup %626  ;;  %v334_v28 = vsel %vm936_vm12, %v331_v19, %v328_v24 }
  0x47   : > { %v407_v43 = vsel %vm399_vm6, %v371_v54, 0.0  ;;  %v416_v44 = vsel %vm414_vm5, %v406_v32, 0.0  ;;  %v343_v34 = vsel %vm948_vm14, %v340_v27, %v337_v40  ;;  %v346_v35 = vmul.f32 0.6931472, %v627_v26 }
  0x48   : > { %v418_v33 = vsel %vm414_vm5, %v407_v43, 0.0  ;;  %v358_v5 = vadd.f32 %v334_v28, %v246_v60  ;;  %v373_v59 = vsub.f32 %v880_v30, %v357_v4  ;;  %v359_v45 = vadd.f32 %v343_v34, %v247_v0 }
  0x49   : > { %v368_v29 = vmul.f32 %v240_v25, %v812_v9  ;;  %v408_v62 = vsel %vm400_vm10, %v372_v58, 0.0  ;;  %v417_v38 = vadd.f32 %v416_v44, %v415_v22  ;;  %v352_v41 = vsel %vm351_vm1, %v349_v21, %v346_v35 }
  0x4a   : > { %v374_v42 = vsub.f32 %v883_v31, %v358_v5  ;;  %v409_v51 = vsel %vm401_vm11, %v373_v59, 0.0  ;;  %v420_v6 = vsel %vm414_vm5, %v408_v62, 0.0  ;;  %v360_v60 = vadd.f32 %v352_v41, %v248_v8 }
  0x4b   : > { %v375_v7 = vsub.f32 %v899_v39, %v359_v45  ;;  %v419_v0 = vadd.f32 %v418_v33, %v417_v38  ;;  %v422_v30 = vsel %vm414_vm5, %v409_v51, 0.0 }
  0x4c   : > { %v410_v46 = vsel %vm402_vm13, %v374_v42, 0.0  ;;  %v376_v61 = vsub.f32 %v368_v29, %v360_v60 }
  0x4d   : > { %v411_v47 = vsel %vm403_vm15, %v375_v7, 0.0  ;;  %v421_v31 = vadd.f32 %v420_v6, %v419_v0  ;;  %v424_v9 = vsel %vm414_vm5, %v410_v46, 0.0 }
  0x4e   : > { %v412_v8 = vsel %vm404_vm2, %v376_v61, 0.0  ;;  %v426_v63 = vsel %vm414_vm5, %v411_v47, 0.0 }
  0x4f   : > { %v423_v39 = vadd.f32 %v422_v30, %v421_v31  ;;  %v428_v48 = vsel %vm414_vm5, %v412_v8, 0.0 }
  0x51   : > { %v425_v55 = vadd.f32 %v424_v9, %v423_v39 }
  0x53   : > { %v427_v10 = vadd.f32 %v426_v63, %v425_v55 }
  0x55   : > { %v429_v12 = vadd.f32 %v428_v48, %v427_v10 }
  0x57   : > { %v430_v13 = vrot.slane %v429_v12, 4 }
  0x59   : > { %v431_v49 = vadd.f32 %v430_v13, %v429_v12 }
  0x5b   : > { %v432_v14 = vrot.slane %v431_v49, 2 }
  0x5d   : > { %v433_v16 = vadd.f32 %v432_v14, %v431_v49 }
  0x5f   : > { %v434_v36 = vrot.slane %v433_v16, 1 }
  0x61   : > { %v435_v19 = vadd.f32 %v434_v36, %v433_v16 }
  0x63   : > { %v436_v15 = vadd.f32 %v435_v19, %v413_v57 }
  0x65   : > { %438 = vst.msk [vmem:[%s785_s25] sm:$0x1] %vm223_vm0, %v436_v15 }
  0x66   : > { %641 = shalt.err (!%p638_p6)
}
  0x67   : > { %s642_s23 = scalar_lea.hbm %s1014_s18, 16  ;;  %s646_s29 = scalar_lea.hbm %s1067_s2, 32 }
  0x68   : > { %p643_p7 = scmp.ne.s32.totalorder %s1014_s18, %s642_s23  ;;  %p647_p11 = scmp.lt.u32.totalorder %s1014_s18, %s1067_s2 }
  0x69   : > { %p648_p12 = scmp.lt.u32.totalorder %s646_s29, %s642_s23  ;;  %p650_p0 = scmp.lt.u32.totalorder %s642_s23, %s1014_s18 }
  0x6a   : > { %p644_p9 = pnand %p643_p7, %p765_p4 }
  0x6b   : > { %p649_p13 = por %p648_p12, %p647_p11 }
  0x6c   : > { %p645_p10 = pneg %p644_p9 }
  0x6d   : > { %p651_p1 = por %p650_p0, %p649_p13 }
  0x6f   : > { %p652_p2 = pnand %p651_p1, %p645_p10 }
  0x71   : > { %655 = shalt.err (!%p652_p2)
}
  0x72   : > { %540 = dma.vmem_to_hbm [thread:$0]  (%p765_p4), %s1016_s8, 16, %s1014_s18, %s440_s20  }
  0x73 PF: > { %p546_p3 = scmp.ge.s32.totalorder %s706_s14, 2  ;;  %s464_s4 = sand.u32 1, %s686_s9  }
  0x74   : > { %s465_s5 = scalar_lea.sflag [#allocation3], %s464_s4 }
  0x75   : > { %p543_p5 = pnand %p546_p3, %p772_p8 }
  0x77   : > { %681 = dma.done.wait (!%p543_p5), %s465_s5, 16  }
  0x78   : > { %683 = vsyncadd (!%p543_p5), %s465_s5, 4294967280  ;;  %s15_s14 = sadd.s32 1, %s706_s14   ;;  %s1084_s9 = smov %s690_s10 }
  0x79   : > { %p12_p6 = scmp.ge.s32.totalorder %s15_s14, 4   ;;  %s1085_s10 = smov %s694_s11 }
  0x7a   : > { %s1086_s11 = smov %s778_s22  ;;  %s1087_s12 = smov %s702_s13 }
  0x7b   : > { %s1088_s13 = smov %s1090_s17  ;;  %14 = sbr.rel (!%p12_p6) target bundleno = 4 (0x4), region = 70 }
  0x82   :  { %469 = vsyncpa [#allocation3], 1 }
  0x83   :  { %471 = vsyncpa [#allocation3 + $0x1], 1 }

</bundles_post_ra>
